<compile_context>
chip_gen: v6e
topology: v6e:2x2x1
jax: 0.10.0
libtpu: 0.0.40
codegen_flags: <defaults>
</compile_context>

<pallas_src>
import jax
import jax.numpy as jnp
from jax.experimental import pallas as pl
from jax.experimental.pallas import tpu as pltpu


def _round_up(x, m):
    return (x + m - 1) // m * m


def _round_down(x, m):
    return (x // m) * m


def _cdiv(a, b):
    return (a + b - 1) // b


def _sublane_multiple(dtype):
    # (8,128) tile for 4-byte dtypes; packed dtypes want 16/32-row alignment.
    itemsize = jnp.dtype(dtype).itemsize
    return max(8, 32 // max(itemsize, 1))


def _tpu_generation_defaults():
    """(target_block_bytes per input, vmem_limit_bytes, two_tensorcores)."""
    kind = ""
    try:
        kind = jax.devices()[0].device_kind.lower()
    except Exception:
        pass
    if "v7" in kind:
        # 2 inputs x 2 buffers x 8 MiB = 32 MiB; keep the limit < 64 MiB physical.
        return 8 << 20, 40 << 20, True
    if "v6" in kind:
        return 6 << 20, 40 << 20, False
    if "v5" in kind:
        # v5e scoped default is only 16 MiB -> raise it explicitly for 3 MiB blocks.
        return 3 << 20, 24 << 20, False
    return 2 << 20, None, False


def _make_partial_kernel(batch, ht, tb, ct, need_row_mask, need_col_mask):
    """One grid step: weighted squared error over a (tb, ct) block -> scalar partial."""

    def kernel(pred_ref, targ_ref, w_ref, out_ref):
        diff = pred_ref[...].astype(jnp.float32) - targ_ref[...].astype(jnp.float32)
        sq = diff * diff

        # Explicit masks for the partial last row/column blocks (the un-DMA'd part of
        # the VMEM buffer is unspecified; garbage * 0-weight could still produce NaN).
        mask = None
        if need_row_mask:
            rows = pl.program_id(0) * tb + jax.lax.broadcasted_iota(
                jnp.int32, (tb, ct), 0)
            mask = rows < batch
        if need_col_mask:
            cols = pl.program_id(1) * ct + jax.lax.broadcasted_iota(
                jnp.int32, (tb, ct), 1)
            cmask = cols < ht
            mask = cmask if mask is None else jnp.logical_and(mask, cmask)
        if mask is not None:
            sq = jnp.where(mask, sq, 0.0)

        # Separable reduction: collapse rows first (VPU/XLU, hidden under DMA),
        # then a single (1, ct) multiply with the VMEM-resident weights row.
        colsum = jnp.sum(sq, axis=0, keepdims=True)
        out_ref[0, 0] = jnp.sum(colsum * w_ref[...].astype(jnp.float32))

    return kernel


def weighted_loss(pred, targ, weights, *, target_block_bytes=None,
                  vmem_limit_bytes=None, min_pallas_bytes=1 << 20):
    """pred, targ: [B, H, T]; weights: [H, T]. Returns scalar f32 mean weighted L2."""
    B, H, T = pred.shape
    assert targ.shape == (B, H, T)
    assert weights.shape == (H, T)

    total_count = B * H * T
    elem_bytes = jnp.dtype(pred.dtype).itemsize

    # Small-input fallback: fixed launch + single-step overhead dominates; let XLA fuse.
    if total_count * elem_bytes < min_pallas_bytes:
        diff = pred.astype(jnp.float32) - targ.astype(jnp.float32)
        return jnp.mean(diff * diff * weights.astype(jnp.float32)[None, :, :])

    gen_block, gen_vmem, two_tc = _tpu_generation_defaults()
    if target_block_bytes is None:
        target_block_bytes = gen_block
    if vmem_limit_bytes is None:
        vmem_limit_bytes = gen_vmem

    HT = H * T
    # No-copy reshapes; inputs stream in their native dtype (bf16 stays bf16).
    pred2 = pred.reshape(B, HT)
    targ2 = targ.reshape(B, HT)
    w2 = weights.reshape(1, HT)

    row_align = _sublane_multiple(pred.dtype)
    row_bytes = HT * elem_bytes

    need_row_mask = False
    need_col_mask = False

    if row_align * row_bytes > target_block_bytes:
        # Very large H*T: tile the lane dim too so a single block always fits VMEM
        # (v7x hits this at half the size of v5e/v6e).
        CT = max(128, _round_down(target_block_bytes // (row_align * elem_bytes), 128))
        GC = _cdiv(HT, CT)
        need_col_mask = (HT % CT) != 0
        TB = B if B < row_align else row_align
        GR = _cdiv(B, TB)
        need_row_mask = (B % TB) != 0
        # Only the tiny weights row is ever padded (so its blocks tile evenly);
        # the big tensors are never copied.
        if GC * CT != HT:
            w2 = jnp.pad(w2, ((0, 0), (0, GC * CT - HT)))
    else:
        # Common case: lane-dense full-row blocks; last dim == full H*T is legal
        # even when H*T % 128 != 0 (Mosaic masks the remainder strip).
        CT = HT
        GC = 1
        rows_target = max(1, target_block_bytes // row_bytes)
        if rows_target >= B:
            TB = B  # single block covering all rows (== full dim, always legal)
        else:
            TB = max(row_align, _round_down(rows_target, row_align))
        GR = _cdiv(B, TB)
        need_row_mask = (B % TB) != 0

    # v7x has 2 TensorCores: make sure the parallel grid has >= 2 steps when B allows.
    if two_tc and GR * GC < 2 and B >= 2 * row_align:
        TB = _round_up(_cdiv(B, 2), row_align)
        GR = _cdiv(B, TB)
        need_row_mask = (B % TB) != 0

    kernel = _make_partial_kernel(B, HT, TB, CT, need_row_mask, need_col_mask)

    partials = pl.pallas_call(
        kernel,
        out_shape=jax.ShapeDtypeStruct((GR, GC), jnp.float32),
        grid=(GR, GC),
        in_specs=[
            pl.BlockSpec((TB, CT), lambda g, c: (g, c)),
            pl.BlockSpec((TB, CT), lambda g, c: (g, c)),
            # Constant row index -> weights row stays resident in VMEM across row steps.
            pl.BlockSpec((1, CT), lambda g, c: (0, c)),
        ],
        out_specs=pl.BlockSpec((1, 1), lambda g, c: (g, c), memory_space=pltpu.SMEM),
        compiler_params=pltpu.CompilerParams(
            # No cross-step accumulator -> both axes parallel (megacore-shardable).
            dimension_semantics=("parallel", "parallel"),
            vmem_limit_bytes=vmem_limit_bytes,
        ),
    )(pred2, targ2, w2)

    return jnp.sum(partials) / jnp.float32(total_count)


def weighted_loss_ref(pred, targ, weights):
    diff = pred.astype(jnp.float32) - targ.astype(jnp.float32)
    return (diff * diff * weights.astype(jnp.float32)[None, :, :]).mean()


if __name__ == "__main__":
    key = jax.random.PRNGKey(0)
    keys = jax.random.split(key, 8)

    # Case 1: canonical small diffuser shape (batch=2, horizon=8, transition_dim=32).
    B, H, T = 2, 8, 32
    pred = jax.random.normal(keys[0], (B, H, T), dtype=jnp.float32)
    targ = jax.random.normal(keys[1], (B, H, T), dtype=jnp.float32)
    discounts = 0.99 ** jnp.arange(H, dtype=jnp.float32)
    dim_w = 1.0 + 0.1 * jnp.arange(T, dtype=jnp.float32) / T
    weights = discounts[:, None] * dim_w[None, :]
    out = jax.block_until_ready(weighted_loss(pred, targ, weights, min_pallas_bytes=0))
    ref = weighted_loss_ref(pred, targ, weights)
    assert jnp.allclose(out, ref, rtol=1e-5, atol=1e-6), (out, ref)

    # Case 2: H*T not a multiple of 128 — unaligned lane dim, no padding copies.
    B2, H2, T2 = 3, 5, 7
    p2 = jax.random.normal(keys[2], (B2, H2, T2), dtype=jnp.float32)
    t2 = jax.random.normal(keys[3], (B2, H2, T2), dtype=jnp.float32)
    w2 = jax.random.uniform(keys[4], (H2, T2), dtype=jnp.float32)
    out2 = jax.block_until_ready(weighted_loss(p2, t2, w2, min_pallas_bytes=0))
    ref2 = weighted_loss_ref(p2, t2, w2)
    assert jnp.allclose(out2, ref2, rtol=1e-5, atol=1e-6), (out2, ref2)

    # Case 3: bf16 inputs, batch not divisible by the row block -> in-kernel row mask,
    #         multi-step grid forced via a tiny block budget.
    B3, H3, T3 = 37, 8, 32
    p3 = jax.random.normal(keys[5], (B3, H3, T3), dtype=jnp.bfloat16)
    t3 = jax.random.normal(keys[6], (B3, H3, T3), dtype=jnp.bfloat16)
    w3 = jax.random.uniform(keys[7], (H3, T3), dtype=jnp.float32)
    out3 = jax.block_until_ready(
        weighted_loss(p3, t3, w3, min_pallas_bytes=0, target_block_bytes=16 * 1024))
    ref3 = weighted_loss_ref(p3, t3, w3)
    assert jnp.allclose(out3, ref3, rtol=1e-4, atol=1e-5), (out3, ref3)

    # Case 4: large H*T with a tiny block budget -> column-tiling path + lane mask.
    B4, H4, T4 = 10, 16, 200
    p4 = jax.random.normal(keys[0], (B4, H4, T4), dtype=jnp.float32)
    t4 = jax.random.normal(keys[1], (B4, H4, T4), dtype=jnp.float32)
    w4 = jax.random.uniform(keys[2], (H4, T4), dtype=jnp.float32)
    out4 = jax.block_until_ready(
        weighted_loss(p4, t4, w4, min_pallas_bytes=0, target_block_bytes=64 * 1024))
    ref4 = weighted_loss_ref(p4, t4, w4)
    assert jnp.allclose(out4, ref4, rtol=1e-5, atol=1e-6), (out4, ref4)

    # Case 5: default small-input fallback (pure jnp) still matches the reference.
    out5 = jax.block_until_ready(weighted_loss(pred, targ, weights))
    assert jnp.allclose(out5, ref, rtol=1e-5, atol=1e-6), (out5, ref)

    print("KERNEL_OK")
</pallas_src>

<mosaic_0001>
module attributes {stable_mosaic.version = 11 : i64} {
  func.func @kernel(%arg0: i32, %arg1: i32, %arg2: memref<2x256xf32, #tpu.memory_space<vmem>>, %arg3: memref<2x256xf32, #tpu.memory_space<vmem>>, %arg4: memref<1x256xf32, #tpu.memory_space<vmem>>, %arg5: memref<1x1xf32, #tpu.memory_space<smem>>) attributes {dimension_semantics = [#tpu.dimension_semantics<parallel>, #tpu.dimension_semantics<parallel>], iteration_bounds = array<i64: 1, 1>, scalar_prefetch = 0 : i64, scratch_operands = 0 : i64, tpu.core_type = #tpu.core_type<tc>, window_params = [{transform_indices = @transform_0, window_bounds = array<i64: 2, 256>}, {transform_indices = @transform_1, window_bounds = array<i64: 2, 256>}, {transform_indices = @transform_2, window_bounds = array<i64: 1, 256>}, {transform_indices = @transform_3, window_bounds = array<i64: 1, 1>}]} {
    %c0 = arith.constant 0 : index
    %c0_0 = arith.constant 0 : index
    %0 = vector.load %arg2[%c0, %c0_0] : memref<2x256xf32, #tpu.memory_space<vmem>>, vector<2x256xf32>
    %c0_1 = arith.constant 0 : index
    %c0_2 = arith.constant 0 : index
    %1 = vector.load %arg3[%c0_1, %c0_2] : memref<2x256xf32, #tpu.memory_space<vmem>>, vector<2x256xf32>
    %2 = arith.subf %0, %1 : vector<2x256xf32>
    %3 = arith.mulf %2, %2 : vector<2x256xf32>
    %cst = arith.constant dense<0.000000e+00> : vector<256xf32>
    %4 = vector.multi_reduction <add>, %3, %cst [0] : vector<2x256xf32> to vector<256xf32>
    %5 = vector.shape_cast %4 : vector<256xf32> to vector<1x256xf32>
    %c0_3 = arith.constant 0 : index
    %c0_4 = arith.constant 0 : index
    %6 = vector.load %arg4[%c0_3, %c0_4] : memref<1x256xf32, #tpu.memory_space<vmem>>, vector<1x256xf32>
    %7 = arith.mulf %5, %6 : vector<1x256xf32>
    %8 = vector.shape_cast %7 : vector<1x256xf32> to vector<1x1x256xf32>
    %cst_5 = arith.constant dense<0.000000e+00> : vector<1xf32>
    %9 = vector.multi_reduction <add>, %8, %cst_5 [1, 2] : vector<1x1x256xf32> to vector<1xf32>
    %10 = vector.shape_cast %9 : vector<1xf32> to vector<1x1x1xf32>
    %11 = vector.extract %10[0, 0, 0] : f32 from vector<1x1x1xf32>
    %c0_6 = arith.constant 0 : index
    %c0_7 = arith.constant 0 : index
    %12 = memref.load %arg5[%c0_6, %c0_7] : memref<1x1xf32, #tpu.memory_space<smem>>
    memref.store %11, %arg5[%c0_6, %c0_7] : memref<1x1xf32, #tpu.memory_space<smem>>
    return
  }
  func.func @transform_0(%arg0: i32, %arg1: i32) -> (i32, i32) {
    %c0_i32 = arith.constant 0 : i32
    return %arg0, %arg1 : i32, i32
  }
  func.func @transform_1(%arg0: i32, %arg1: i32) -> (i32, i32) {
    %c0_i32 = arith.constant 0 : i32
    return %arg0, %arg1 : i32, i32
  }
  func.func @transform_2(%arg0: i32, %arg1: i32) -> (i32, i32) {
    %c0_i32 = arith.constant 0 : i32
    %c0_i32_0 = arith.constant 0 : i32
    return %c0_i32, %arg1 : i32, i32
  }
  func.func @transform_3(%arg0: i32, %arg1: i32) -> (i32, i32) {
    %c0_i32 = arith.constant 0 : i32
    return %arg0, %arg1 : i32, i32
  }
}

</mosaic_0001>

<bundles_post_ra>
// kernel: tpu_custom_call.1
= control target key start
LH: loop header
LB: loop body
LE: loop exit
PB: predicated region body
PF: predicated region fallthrough
CT: control target
= control target key end

     0   :  { %8 = vsyncpa [#allocation3], 0  ;;  %s209_s0 = inlined_call_operand.hbm [shape: f32[2,256], index: 0, kind: input, shape index: {}]   ;;  %s210_s1 = inlined_call_operand.hbm [shape: f32[2,256], index: 1, kind: input, shape index: {}]   ;;  %s211_s2 = inlined_call_operand.vmem [shape: f32[1,256], index: 2, kind: input, shape index: {}]   ;;  %s212_s3 = inlined_call_operand.hbm [shape: f32[1,1], index: 3, kind: output, shape index: {}]  }
   0x1   :  { %9 = vsyncpa [#allocation6], 0 }
   0x2   :  { %10 = vsyncpa [#allocation4], 0  ;;  %s173_s12 = smov [#allocation2]   ;;  %s174_s14 = smov [#allocation5]  }
   0x3   :  { %s17_s13 = sshll.u32 %s173_s12, 4  ;;  %s27_s15 = sshll.u32 %s174_s14, 4  ;;  %s18_s13 = int_to_ptr.vmem [resolvable:$true] %s17_s13  ;;  %s28_s15 = int_to_ptr.vmem [resolvable:$true] %s27_s15 }
   0x4   :  { %s127_s16 = scalar_lea.vmem %s18_s13, 64  ;;  %p132_p1 = scmp.lt.s32.totalorder %s18_s13, %s18_s13 }
   0x5   :  { %p128_p0 = scmp.ne.s32.totalorder %s18_s13, %s127_s16  ;;  %p133_p2 = scmp.lt.s32.totalorder %s127_s16, %s127_s16 }
   0x7   :  { %p134_p3 = por %p133_p2, %p132_p1 }
   0x9   :  { %p135_p4 = pnand %p134_p3, %p128_p0 }
   0xb   :  { %138 = shalt.err (!%p135_p4)
}
   0xc   :  { %20 = dma.hbm_to_vmem [thread:$0]  %s209_s0, 64, %s18_s13, [#allocation3]  }
   0xd   :  { %s147_s19 = scalar_lea.vmem %s28_s15, 64  ;;  %p152_p6 = scmp.lt.s32.totalorder %s28_s15, %s28_s15 }
   0xe   :  { %p148_p5 = scmp.ne.s32.totalorder %s28_s15, %s147_s19  ;;  %p153_p7 = scmp.lt.s32.totalorder %s147_s19, %s147_s19 }
  0x10   :  { %p154_p8 = por %p153_p7, %p152_p6 }
  0x12   :  { %p155_p9 = pnand %p154_p8, %p148_p5 }
  0x14   :  { %158 = shalt.err (!%p155_p9)
}
  0x15   :  { %30 = dma.hbm_to_vmem [thread:$0]  %s210_s1, 64, %s28_s15, [#allocation6]  }
  0x16   :  { %167 = dma.done.wait [#allocation3], 64  }
  0x17   :  { %168 = vsyncadd [#allocation3], 4294967232 }
  0x18   :  { %169 = dma.done.wait [#allocation6], 64  }
  0x19   :  { %170 = vsyncadd [#allocation6], 4294967232  ;;  %v47_v0 = vlaneseq  ;;  %v175_v1 = vmov 1983009808   ;;  %v39_v5 = vld [vmem:[#allocation2] sm:$0xf] }
  0x1a   :  { %v45_v2 = vunpack.c.l.s4 %v175_v1  ;;  %v40_v6 = vld [vmem:[#allocation5] sm:$0xf]  ;;  %vm54_vm0 = vcmask 1041408   ;;  %v69_v20 = vld [vmem:[%s211_s2] sm:$0x3]  ;;  %vm83_vm1 = vcmask 1040384  }
  0x1b   :  { %v48_v4 = vshrl.u32 %v47_v0, 7  ;;  %v41_v7 = vsub.f32 %v39_v5, %v40_v6  ;;  %s176_s22 = smov [#allocation7]  }
  0x1c   :  { %v46_v3 = vunpack.c.0.s8 %v45_v2 }
  0x1d   :  { %v42_v9 = vmul.f32 %v41_v7, %v41_v7  ;;  %v73_v19 = vsub.s32 0, %v48_v4  ;;  %v77_v23 = vsub.s32 1, %v48_v4 }
  0x1e   :  { %v49_v8 = vsub.s32 %v46_v3, %v48_v4 }
  0x1f   :  { %v74_v26 = vrot.slane %v69_v20, %v73_v19  ;;  %v78_v29 = vrot.slane %v69_v20, %v77_v23 }
  0x20   :  { %v50_v10 = vrot.slane %v42_v9, %v49_v8 }
  0x22   :  { %v51_v11 = vcombine.high %v50_v10, %v50_v10  ;;  %v55_v12 = vsel %vm54_vm0, %v50_v10, 0.0 }
  0x23   :  { %v56_v13 = vrot.slane %v55_v12, 4 }
  0x24   :  { %v62_v14 = vsel %vm54_vm0, %v51_v11, 0.0 }
  0x25   :  { %v57_v15 = vadd.f32 %v56_v13, %v55_v12  ;;  %v63_v16 = vrot.slane %v62_v14, 4 }
  0x27   :  { %v58_v17 = vrot.slane %v57_v15, 2  ;;  %v64_v18 = vadd.f32 %v63_v16, %v62_v14 }
  0x29   :  { %v59_v21 = vadd.f32 %v58_v17, %v57_v15  ;;  %v65_v22 = vrot.slane %v64_v18, 2 }
  0x2b   :  { %v60_v24 = vrot.slane %v59_v21, 1  ;;  %v66_v25 = vadd.f32 %v65_v22, %v64_v18 }
  0x2d   :  { %v61_v27 = vadd.f32 %v60_v24, %v59_v21  ;;  %v67_v28 = vrot.slane %v66_v25, 1 }
  0x2f   :  { %v68_v30 = vadd.f32 %v67_v28, %v66_v25  ;;  %v81_v31 = vmul.f32 %v74_v26, %v61_v27 }
  0x31   :  { %v82_v32 = vmul.f32 %v78_v29, %v68_v30  ;;  %v84_v33 = vsel %vm83_vm1, %v81_v31, 0.0 }
  0x33   :  { %v85_v34 = vsel %vm83_vm1, %v82_v32, 0.0 }
  0x34   :  { %v86_v35 = vadd.f32 %v85_v34, %v84_v33 }
  0x36   :  { %87 = vadd.xlane.f32.xlu0 %v86_v35 }
  0xbf   :  { %v88_v36 = vpop.xlane.xlu0 %87 }
  0xc0   :  { %v89_v37 = vrot.slane %v88_v36, 4 }
  0xc2   :  { %v90_v38 = vadd.f32 %v89_v37, %v88_v36 }
  0xc4   :  { %v91_v39 = vrot.slane %v90_v38, 2 }
  0xc6   :  { %v92_v40 = vadd.f32 %v91_v39, %v90_v38 }
  0xc8   :  { %v93_v41 = vrot.slane %v92_v40, 1 }
  0xca   :  { %v94_v42 = vadd.f32 %v93_v41, %v92_v40 }
  0xcc   :  { %113 = vpush %v94_v42 }
  0xfd   :  { %s114_s2 = spop %113 }
  0xfe   :  { %97 = sst [smem:[#allocation7]] %s114_s2 }
  0xff   :  { %105 = dma.smem_to_hbm %s176_s22, 16, %s212_s3, [#allocation4]  }
 0x100   :  { %171 = dma.done.wait [#allocation4], 16  }
 0x101   :  { %172 = vsyncadd [#allocation4], 4294967280 }
 0x102   :  { %109 = sfence }
 0x103   :  { %110 = vsyncpa [#allocation3], 1 }
 0x104   :  { %111 = vsyncpa [#allocation6], 1 }
 0x105   :  { %112 = vsyncpa [#allocation4], 1 }

</bundles_post_ra>
